<compile_context>
chip_gen: v5e
topology: v5e:2x2
jax: 0.10.0
libtpu: 0.0.40
codegen_flags: <defaults>
</compile_context>

<pallas_src>
import functools

import jax
import jax.numpy as jnp
import numpy as np
from jax.experimental import pallas as pl
from jax.experimental.pallas import tpu as pltpu


# ---------------------------------------------------------------------------
# Stage 1: streamed per-row saliency norms (HBM-roofline bound).
# ---------------------------------------------------------------------------
def _row_norm_kernel(t_grad_ref, t_hid_ref, s_grad_ref, s_hid_ref,
                     t_out_ref, s_out_ref, *,
                     total_step, top_k, num_tiles, rows_valid_last):
    rows, h = t_grad_ref.shape

    # Load in native dtype (bf16 halves HBM traffic), do math in f32.
    t_sal = t_grad_ref[...].astype(jnp.float32) * t_hid_ref[...].astype(jnp.float32)
    s_sal = s_grad_ref[...].astype(jnp.float32) * s_hid_ref[...].astype(jnp.float32)

    # ---- teacher: sum of the top_k largest squared saliencies along H ------
    # Selection runs directly on squared values (monotone in |.|): drops the
    # |.| pass and the m*m per iteration.  Bulk knock-out with
    # take = min(count, remaining) is tie-safe, and the -1 sentinel can never
    # be accumulated: rem reaches 0 before every finite entry is knocked out,
    # so take == 0 from then on.
    # NOTE: O(top_k) cross-lane (XLU) passes; fine for SinKD's small top_k.
    # For top_k >> 8 a chunked running-top-k held in vregs would be needed.
    x2 = t_sal * t_sal
    acc = jnp.zeros((rows, 1), jnp.float32)
    rem = jnp.full((rows, 1), jnp.float32(top_k))
    for _ in range(top_k):
        m = jnp.max(x2, axis=-1, keepdims=True)
        is_max = x2 == m
        cnt = jnp.sum(is_max.astype(jnp.float32), axis=-1, keepdims=True)
        take = jnp.minimum(cnt, rem)
        acc = acc + take * m
        rem = rem - take
        x2 = jnp.where(is_max, jnp.float32(-1.0), x2)

    # 1/total_step folded out of the full-tile multiplies (two fewer
    # whole-tile VALU passes); applied to the tiny (rows, 1) norms instead.
    # Top-k selection and the downstream dim=1 normalize are unaffected.
    inv_step = jnp.float32(1.0 / total_step)
    t_row = jnp.sqrt(acc) * inv_step                               # (rows, 1)

    # ---- student: plain L2 norm along H ------------------------------------
    s_sq = s_sal * s_sal
    if h % 128 == 0:
        # BERT-sized hidden dims: do the row reduction on the otherwise idle
        # MXU instead of the XLU (which the top-k loop already uses heavily).
        ones_h = jnp.ones((h, 1), jnp.float32)
        s_ss = jnp.dot(s_sq, ones_h,
                       precision=jax.lax.Precision.HIGHEST,
                       preferred_element_type=jnp.float32)
    else:
        s_ss = jnp.sum(s_sq, axis=-1, keepdims=True)
    s_row = jnp.sqrt(s_ss) * inv_step                              # (rows, 1)

    # ---- lane-dense writeback -----------------------------------------------
    # Rows land in the lane dimension of a (1, 1, rows) block: unmasked vst and
    # whole-vreg relayout once tile_rows is a multiple of 128.
    t_out = jnp.transpose(t_row, (1, 0)).reshape(1, 1, rows)
    s_out = jnp.transpose(s_row, (1, 0)).reshape(1, 1, rows)

    if rows_valid_last != rows:            # static: only traced on ragged grids
        lane = jax.lax.broadcasted_iota(jnp.int32, (1, 1, rows), 2)
        valid = jnp.logical_or(pl.program_id(0) != num_tiles - 1,
                               lane < rows_valid_last)
        t_out = jnp.where(valid, t_out, jnp.float32(0.0))
        s_out = jnp.where(valid, s_out, jnp.float32(0.0))

    t_out_ref[...] = t_out
    s_out_ref[...] = s_out


# ---------------------------------------------------------------------------
# Tile sizing
# ---------------------------------------------------------------------------
def _pick_tile_rows(R, max_rows):
    """Largest row tile that fits the VMEM budget and divides R exactly (so no
    jnp.pad of the inputs and no ragged tail), preferring multiples of 128
    (unmasked lane-dense stores, whole-vreg relayout, bf16 sublane tiling) and
    an even tile count (balanced split across v7x's two TensorCores).
    Returns None if no exact divisor works (caller uses the ragged fallback)."""
    cap = max(1, min(R, max_rows, 2048))
    mult128 = [t for t in range(cap, 0, -1) if R % t == 0 and t % 128 == 0]
    if mult128:
        even = [t for t in mult128 if (R // t) % 2 == 0]
        if even and 2 * even[0] >= mult128[0]:
            return even[0]
        return mult128[0]
    mult8 = [t for t in range(cap, 0, -1) if R % t == 0 and t % 8 == 0]
    if mult8:
        return mult8[0]
    if R <= max_rows:
        return R          # full-extent block: allowed regardless of 8-alignment
    return None


# ---------------------------------------------------------------------------
# Wrapper (Stage 1 Pallas + Stage 2 tiny XLA epilogue)
# ---------------------------------------------------------------------------
@functools.partial(jax.jit,
                   static_argnames=("total_step", "top_k", "norm_p", "loss_func"))
def integrated_gradient_mse_loss(t_grad_sum, t_hidden, s_grad_sum, s_hidden, *,
                                 total_step, top_k, norm_p, loss_func):
    """Inputs are [B, S, H] arrays.  Supplying bf16 inputs halves Stage-1 HBM
    traffic; math inside the kernel is f32 either way."""
    B, S, H = t_grad_sum.shape
    R = B * S
    top_k = min(int(top_k), int(H))        # guard: top_k <= H

    # --- VMEM-budgeted tile sizing -------------------------------------------
    # Per row of a tile: 4 inputs x 2 pipeline buffers in native dtype plus the
    # f32 working set inside the kernel (t_sal/s_sal/x2/mask/...).  Keep the
    # total near 36 MiB and raise the scoped VMEM limit to 48 MiB explicitly:
    # comfortably inside v5e/v6e (128 MiB physical, 16/32 MiB scoped default)
    # and ~16 MiB of headroom on v7x (64 MiB physical).
    itemsize = int(jnp.dtype(t_grad_sum.dtype).itemsize)
    per_row_bytes = 4 * 2 * H * itemsize + 6 * H * 4 + 16
    budget = 36 * 1024 * 1024
    max_rows = max(8, budget // per_row_bytes)

    tile_rows = _pick_tile_rows(R, max_rows)
    if tile_rows is None:
        # Ragged fallback: no exact divisor fits the budget.  Mask tail rows
        # in-kernel instead of jnp.pad-ing all 4 inputs (padding would re-read
        # and re-write every tensor in HBM before an already HBM-bound kernel).
        tile_rows = (max_rows // 128) * 128 if max_rows >= 128 else (max_rows // 8) * 8
        tile_rows = max(8, tile_rows)
    num_tiles = int(pl.cdiv(R, tile_rows))
    Rp = num_tiles * tile_rows
    rows_valid_last = R - (num_tiles - 1) * tile_rows

    kernel = functools.partial(
        _row_norm_kernel, total_step=int(total_step), top_k=top_k,
        num_tiles=num_tiles, rows_valid_last=int(rows_valid_last))

    row_spec = pl.BlockSpec((tile_rows, H), lambda i: (i, 0))
    out_spec = pl.BlockSpec((1, 1, tile_rows), lambda i: (i, 0, 0))

    args2d = [x.reshape(R, H)              # no pad: tile_rows divides R (or
              for x in (t_grad_sum, t_hidden, s_grad_sum, s_hidden)]  # ragged-masked)

    t_rows3, s_rows3 = pl.pallas_call(
        kernel,
        out_shape=(jax.ShapeDtypeStruct((num_tiles, 1, tile_rows), jnp.float32),
                   jax.ShapeDtypeStruct((num_tiles, 1, tile_rows), jnp.float32)),
        grid_spec=pltpu.PrefetchScalarGridSpec(
            num_scalar_prefetch=0,
            grid=(num_tiles,),
            in_specs=[row_spec] * 4,
            out_specs=[out_spec, out_spec]),
        compiler_params=pltpu.CompilerParams(
            dimension_semantics=("parallel",),       # shards over v7x's 2 TCs
            vmem_limit_bytes=48 * 1024 * 1024),
    )(*args2d)

    # --- Stage 2: dim=1 F.normalize + loss over B*S scalars -------------------
    # Tiny (KBs); plain XLA per review to save a second kernel launch and the
    # intermediate round trip.  When Rp == R the slice is a no-op.
    t_row = t_rows3.reshape(Rp)[:R].reshape(B, S)
    s_row = s_rows3.reshape(Rp)[:R].reshape(B, S)

    p = float(norm_p)
    eps = jnp.float32(1e-12)                 # PyTorch F.normalize default eps

    def _normalize(v):
        if p == 2.0:
            den = jnp.sqrt(jnp.sum(v * v, axis=1, keepdims=True))
        elif p == 1.0:
            den = jnp.sum(jnp.abs(v), axis=1, keepdims=True)
        else:
            den = jnp.power(jnp.sum(jnp.power(jnp.abs(v), p), axis=1,
                                    keepdims=True), 1.0 / p)
        return v / jnp.maximum(den, eps)

    t_n = _normalize(t_row)
    s_n = _normalize(s_row)
    d = t_n - s_n
    if loss_func == "L1":
        per = jnp.abs(d)
    elif loss_func == "L2":
        per = d * d
    elif loss_func == "smoothL1":            # beta = 1.0 (PyTorch default)
        ad = jnp.abs(d)
        per = jnp.where(ad < 1.0, 0.5 * d * d, ad - 0.5)
    else:
        raise ValueError(f"unknown loss_func {loss_func!r}")

    # NOTE: nz == 0 -> inf/nan, matching PyTorch's division-by-zero behavior.
    nz = jnp.sum((t_n != 0).astype(jnp.float32))
    return jnp.sum(per) / nz


# ---------------------------------------------------------------------------
# Pure-JAX reference of the same math for verification.
# ---------------------------------------------------------------------------
def _reference(t_grad_sum, t_hidden, s_grad_sum, s_hidden,
               *, total_step, top_k, norm_p, loss_func):
    t_sal = (t_grad_sum.astype(jnp.float32) / total_step) * t_hidden.astype(jnp.float32)
    s_sal = (s_grad_sum.astype(jnp.float32) / total_step) * s_hidden.astype(jnp.float32)
    t_topk, _ = jax.lax.top_k(jnp.abs(t_sal), min(top_k, t_sal.shape[-1]))
    t_row = jnp.sqrt(jnp.sum(t_topk * t_topk, axis=-1))
    s_row = jnp.sqrt(jnp.sum(s_sal * s_sal, axis=-1))

    def nrm(v):
        den = jnp.power(jnp.sum(jnp.power(jnp.abs(v), norm_p),
                                axis=1, keepdims=True), 1.0 / norm_p)
        return v / jnp.maximum(den, 1e-12)

    t_n, s_n = nrm(t_row), nrm(s_row)
    d = t_n - s_n
    if loss_func == "L1":
        per = jnp.abs(d)
    elif loss_func == "L2":
        per = d * d
    else:
        ad = jnp.abs(d)
        per = jnp.where(ad < 1.0, 0.5 * d * d, ad - 0.5)
    return jnp.sum(per) / jnp.sum(t_n != 0)


if __name__ == "__main__":
    # hyperparameters of integrated_gradient_mse(__init__)
    TOTAL_STEP, TOP_K, NORM, LOSS_FUNC = 3, 4, 2, "L2"

    B, S, H = 2, 8, 32  # batch, sequence, hidden
    key = jax.random.PRNGKey(0)
    k1, k2, k3, k4 = jax.random.split(key, 4)
    # accumulated-over-steps gradients and first hidden states (teacher/student)
    t_grad_sum = jax.random.normal(k1, (B, S, H), dtype=jnp.float32)
    t_hidden = jax.random.normal(k2, (B, S, H), dtype=jnp.float32)
    s_grad_sum = jax.random.normal(k3, (B, S, H), dtype=jnp.float32)
    s_hidden = jax.random.normal(k4, (B, S, H), dtype=jnp.float32)

    loss = integrated_gradient_mse_loss(
        t_grad_sum, t_hidden, s_grad_sum, s_hidden,
        total_step=TOTAL_STEP, top_k=TOP_K, norm_p=NORM, loss_func=LOSS_FUNC)
    loss = jax.block_until_ready(loss)

    ref = _reference(
        t_grad_sum, t_hidden, s_grad_sum, s_hidden,
        total_step=TOTAL_STEP, top_k=TOP_K, norm_p=NORM, loss_func=LOSS_FUNC)
    np.testing.assert_allclose(np.asarray(loss), np.asarray(ref),
                               rtol=1e-4, atol=1e-6)
    print("KERNEL_OK")
</pallas_src>

<mosaic_0001>
module attributes {stable_mosaic.version = 11 : i64} {
  func.func @_row_norm_kernel(%arg0: i32, %arg1: memref<16x32xf32, #tpu.memory_space<vmem>>, %arg2: memref<16x32xf32, #tpu.memory_space<vmem>>, %arg3: memref<16x32xf32, #tpu.memory_space<vmem>>, %arg4: memref<16x32xf32, #tpu.memory_space<vmem>>, %arg5: memref<1x1x16xf32, #tpu.memory_space<vmem>>, %arg6: memref<1x1x16xf32, #tpu.memory_space<vmem>>) attributes {dimension_semantics = [#tpu.dimension_semantics<parallel>], iteration_bounds = array<i64: 1>, scalar_prefetch = 0 : i64, scratch_operands = 0 : i64, tpu.core_type = #tpu.core_type<tc>, window_params = [{transform_indices = @transform_0, window_bounds = array<i64: 16, 32>}, {transform_indices = @transform_1, window_bounds = array<i64: 16, 32>}, {transform_indices = @transform_2, window_bounds = array<i64: 16, 32>}, {transform_indices = @transform_3, window_bounds = array<i64: 16, 32>}, {transform_indices = @transform_4, window_bounds = array<i64: 1, 1, 16>}, {transform_indices = @transform_5, window_bounds = array<i64: 1, 1, 16>}]} {
    %c0 = arith.constant 0 : index
    %c0_0 = arith.constant 0 : index
    %0 = vector.load %arg1[%c0, %c0_0] : memref<16x32xf32, #tpu.memory_space<vmem>>, vector<16x32xf32>
    %c0_1 = arith.constant 0 : index
    %c0_2 = arith.constant 0 : index
    %1 = vector.load %arg2[%c0_1, %c0_2] : memref<16x32xf32, #tpu.memory_space<vmem>>, vector<16x32xf32>
    %2 = arith.mulf %0, %1 : vector<16x32xf32>
    %c0_3 = arith.constant 0 : index
    %c0_4 = arith.constant 0 : index
    %3 = vector.load %arg3[%c0_3, %c0_4] : memref<16x32xf32, #tpu.memory_space<vmem>>, vector<16x32xf32>
    %c0_5 = arith.constant 0 : index
    %c0_6 = arith.constant 0 : index
    %4 = vector.load %arg4[%c0_5, %c0_6] : memref<16x32xf32, #tpu.memory_space<vmem>>, vector<16x32xf32>
    %5 = arith.mulf %3, %4 : vector<16x32xf32>
    %6 = arith.mulf %2, %2 : vector<16x32xf32>
    %cst = arith.constant 0.000000e+00 : f32
    %7 = vector.broadcast %cst : f32 to vector<16x1xf32>
    %cst_7 = arith.constant 4.000000e+00 : f32
    %8 = vector.broadcast %cst_7 : f32 to vector<16x1xf32>
    %cst_8 = arith.constant dense<0xFF800000> : vector<16xf32>
    %9 = vector.multi_reduction <maximumf>, %6, %cst_8 [1] : vector<16x32xf32> to vector<16xf32>
    %10 = vector.shape_cast %9 : vector<16xf32> to vector<16x1xf32>
    %11 = vector.broadcast %10 : vector<16x1xf32> to vector<16x32xf32>
    %12 = arith.cmpf oeq, %6, %11 : vector<16x32xf32>
    %13 = arith.extui %12 : vector<16x32xi1> to vector<16x32xi32>
    %14 = arith.sitofp %13 : vector<16x32xi32> to vector<16x32xf32>
    %cst_9 = arith.constant dense<0.000000e+00> : vector<16xf32>
    %15 = vector.multi_reduction <add>, %14, %cst_9 [1] : vector<16x32xf32> to vector<16xf32>
    %16 = vector.shape_cast %15 : vector<16xf32> to vector<16x1xf32>
    %17 = arith.minimumf %16, %8 : vector<16x1xf32>
    %18 = arith.mulf %17, %10 : vector<16x1xf32>
    %19 = arith.addf %7, %18 : vector<16x1xf32>
    %20 = arith.subf %8, %17 : vector<16x1xf32>
    %cst_10 = arith.constant -1.000000e+00 : f32
    %21 = vector.broadcast %cst_10 : f32 to vector<16x32xf32>
    %22 = arith.select %12, %21, %6 : vector<16x32xi1>, vector<16x32xf32>
    %cst_11 = arith.constant dense<0xFF800000> : vector<16xf32>
    %23 = vector.multi_reduction <maximumf>, %22, %cst_11 [1] : vector<16x32xf32> to vector<16xf32>
    %24 = vector.shape_cast %23 : vector<16xf32> to vector<16x1xf32>
    %25 = vector.broadcast %24 : vector<16x1xf32> to vector<16x32xf32>
    %26 = arith.cmpf oeq, %22, %25 : vector<16x32xf32>
    %27 = arith.extui %26 : vector<16x32xi1> to vector<16x32xi32>
    %28 = arith.sitofp %27 : vector<16x32xi32> to vector<16x32xf32>
    %cst_12 = arith.constant dense<0.000000e+00> : vector<16xf32>
    %29 = vector.multi_reduction <add>, %28, %cst_12 [1] : vector<16x32xf32> to vector<16xf32>
    %30 = vector.shape_cast %29 : vector<16xf32> to vector<16x1xf32>
    %31 = arith.minimumf %30, %20 : vector<16x1xf32>
    %32 = arith.mulf %31, %24 : vector<16x1xf32>
    %33 = arith.addf %19, %32 : vector<16x1xf32>
    %34 = arith.subf %20, %31 : vector<16x1xf32>
    %cst_13 = arith.constant -1.000000e+00 : f32
    %35 = vector.broadcast %cst_13 : f32 to vector<16x32xf32>
    %36 = arith.select %26, %35, %22 : vector<16x32xi1>, vector<16x32xf32>
    %cst_14 = arith.constant dense<0xFF800000> : vector<16xf32>
    %37 = vector.multi_reduction <maximumf>, %36, %cst_14 [1] : vector<16x32xf32> to vector<16xf32>
    %38 = vector.shape_cast %37 : vector<16xf32> to vector<16x1xf32>
    %39 = vector.broadcast %38 : vector<16x1xf32> to vector<16x32xf32>
    %40 = arith.cmpf oeq, %36, %39 : vector<16x32xf32>
    %41 = arith.extui %40 : vector<16x32xi1> to vector<16x32xi32>
    %42 = arith.sitofp %41 : vector<16x32xi32> to vector<16x32xf32>
    %cst_15 = arith.constant dense<0.000000e+00> : vector<16xf32>
    %43 = vector.multi_reduction <add>, %42, %cst_15 [1] : vector<16x32xf32> to vector<16xf32>
    %44 = vector.shape_cast %43 : vector<16xf32> to vector<16x1xf32>
    %45 = arith.minimumf %44, %34 : vector<16x1xf32>
    %46 = arith.mulf %45, %38 : vector<16x1xf32>
    %47 = arith.addf %33, %46 : vector<16x1xf32>
    %48 = arith.subf %34, %45 : vector<16x1xf32>
    %cst_16 = arith.constant -1.000000e+00 : f32
    %49 = vector.broadcast %cst_16 : f32 to vector<16x32xf32>
    %50 = arith.select %40, %49, %36 : vector<16x32xi1>, vector<16x32xf32>
    %cst_17 = arith.constant dense<0xFF800000> : vector<16xf32>
    %51 = vector.multi_reduction <maximumf>, %50, %cst_17 [1] : vector<16x32xf32> to vector<16xf32>
    %52 = vector.shape_cast %51 : vector<16xf32> to vector<16x1xf32>
    %53 = vector.broadcast %52 : vector<16x1xf32> to vector<16x32xf32>
    %54 = arith.cmpf oeq, %50, %53 : vector<16x32xf32>
    %55 = arith.extui %54 : vector<16x32xi1> to vector<16x32xi32>
    %56 = arith.sitofp %55 : vector<16x32xi32> to vector<16x32xf32>
    %cst_18 = arith.constant dense<0.000000e+00> : vector<16xf32>
    %57 = vector.multi_reduction <add>, %56, %cst_18 [1] : vector<16x32xf32> to vector<16xf32>
    %58 = vector.shape_cast %57 : vector<16xf32> to vector<16x1xf32>
    %59 = arith.minimumf %58, %48 : vector<16x1xf32>
    %60 = arith.mulf %59, %52 : vector<16x1xf32>
    %61 = arith.addf %47, %60 : vector<16x1xf32>
    %62 = math.sqrt %61 : vector<16x1xf32>
    %cst_19 = arith.constant 0.333333343 : f32
    %63 = vector.broadcast %cst_19 : f32 to vector<16x1xf32>
    %64 = arith.mulf %62, %63 : vector<16x1xf32>
    %65 = arith.mulf %5, %5 : vector<16x32xf32>
    %cst_20 = arith.constant dense<0.000000e+00> : vector<16xf32>
    %66 = vector.multi_reduction <add>, %65, %cst_20 [1] : vector<16x32xf32> to vector<16xf32>
    %67 = vector.shape_cast %66 : vector<16xf32> to vector<16x1xf32>
    %68 = math.sqrt %67 : vector<16x1xf32>
    %cst_21 = arith.constant 0.333333343 : f32
    %69 = vector.broadcast %cst_21 : f32 to vector<16x1xf32>
    %70 = arith.mulf %68, %69 : vector<16x1xf32>
    %71 = tpu.transpose %64, [1, 0] : vector<16x1xf32> -> vector<1x16xf32>
    %72 = vector.shape_cast %71 : vector<1x16xf32> to vector<1x1x16xf32>
    %73 = tpu.transpose %70, [1, 0] : vector<16x1xf32> -> vector<1x16xf32>
    %74 = vector.shape_cast %73 : vector<1x16xf32> to vector<1x1x16xf32>
    %c0_22 = arith.constant 0 : index
    %c0_23 = arith.constant 0 : index
    %c0_24 = arith.constant 0 : index
    %75 = vector.load %arg5[%c0_22, %c0_23, %c0_24] : memref<1x1x16xf32, #tpu.memory_space<vmem>>, vector<1x1x16xf32>
    tpu.vector_store %arg5[%c0_22, %c0_23, %c0_24], %72 {strides = array<i32>} : memref<1x1x16xf32, #tpu.memory_space<vmem>>, vector<1x1x16xf32>,
    %c0_25 = arith.constant 0 : index
    %c0_26 = arith.constant 0 : index
    %c0_27 = arith.constant 0 : index
    %76 = vector.load %arg6[%c0_25, %c0_26, %c0_27] : memref<1x1x16xf32, #tpu.memory_space<vmem>>, vector<1x1x16xf32>
    tpu.vector_store %arg6[%c0_25, %c0_26, %c0_27], %74 {strides = array<i32>} : memref<1x1x16xf32, #tpu.memory_space<vmem>>, vector<1x1x16xf32>,
    return
  }
  func.func @transform_0(%arg0: i32) -> (i32, i32) {
    %c0_i32 = arith.constant 0 : i32
    %c0_i32_0 = arith.constant 0 : i32
    return %arg0, %c0_i32 : i32, i32
  }
  func.func @transform_1(%arg0: i32) -> (i32, i32) {
    %c0_i32 = arith.constant 0 : i32
    %c0_i32_0 = arith.constant 0 : i32
    return %arg0, %c0_i32 : i32, i32
  }
  func.func @transform_2(%arg0: i32) -> (i32, i32) {
    %c0_i32 = arith.constant 0 : i32
    %c0_i32_0 = arith.constant 0 : i32
    return %arg0, %c0_i32 : i32, i32
  }
  func.func @transform_3(%arg0: i32) -> (i32, i32) {
    %c0_i32 = arith.constant 0 : i32
    %c0_i32_0 = arith.constant 0 : i32
    return %arg0, %c0_i32 : i32, i32
  }
  func.func @transform_4(%arg0: i32) -> (i32, i32, i32) {
    %c0_i32 = arith.constant 0 : i32
    %c0_i32_0 = arith.constant 0 : i32
    %c0_i32_1 = arith.constant 0 : i32
    return %arg0, %c0_i32, %c0_i32_0 : i32, i32, i32
  }
  func.func @transform_5(%arg0: i32) -> (i32, i32, i32) {
    %c0_i32 = arith.constant 0 : i32
    %c0_i32_0 = arith.constant 0 : i32
    %c0_i32_1 = arith.constant 0 : i32
    return %arg0, %c0_i32, %c0_i32_0 : i32, i32, i32
  }
}

</mosaic_0001>

<bundles_post_ra>
// kernel: integrated_gradient_mse_loss.1
= control target key start
LH: loop header
LB: loop body
LE: loop exit
PB: predicated region body
PF: predicated region fallthrough
CT: control target
= control target key end

     0   :  { %11 = vsyncpa [#allocation3], 0  ;;  %s577_s0 = inlined_call_operand.hbm [shape: f32[16,32], index: 0, kind: input, shape index: {}]   ;;  %s578_s1 = inlined_call_operand.hbm [shape: f32[16,32], index: 1, kind: input, shape index: {}]   ;;  %s579_s2 = inlined_call_operand.hbm [shape: f32[16,32], index: 2, kind: input, shape index: {}]   ;;  %s580_s3 = inlined_call_operand.hbm [shape: f32[16,32], index: 3, kind: input, shape index: {}]   ;;  %s581_s4 = inlined_call_operand.vmem [shape: f32[1,1,16], index: 4, kind: output, shape index: {0}]   ;;  %s582_s5 = inlined_call_operand.vmem [shape: f32[1,1,16], index: 5, kind: output, shape index: {1}]  }
   0x1   :  { %12 = vsyncpa [#allocation5], 0 }
   0x2   :  { %13 = vsyncpa [#allocation8], 0  ;;  %s31_s20 = sshll.u32 %s578_s1, 4  ;;  %s468_s21 = smov [#allocation4]   ;;  %s32_s20 = int_to_ptr.hbm [resolvable:$true] %s31_s20 }
   0x3   :  { %s33_s22 = sshll.u32 %s468_s21, 4  ;;  %s18_s25 = sshll.u32 %s577_s0, 4  ;;  %s34_s22 = int_to_ptr.vmem [resolvable:$true] %s33_s22  ;;  %s19_s25 = int_to_ptr.hbm [resolvable:$true] %s18_s25 }
   0x4   :  { %s469_s26 = smov 128   ;;  %s470_s27 = smov 8  }
   0x5   :  { %39 = dma.hbm_to_vmem [thread:$0]  %s32_s20, 256, %s34_s22, [#allocation5], %s469_s26, %s469_s26, %s470_s27  }
   0x6   :  { %s471_s28 = smov [#allocation2]   ;;  %s44_s7 = sshll.u32 %s579_s2, 4  ;;  %s45_s7 = int_to_ptr.hbm [resolvable:$true] %s44_s7 }
   0x7   :  { %s20_s29 = sshll.u32 %s471_s28, 4  ;;  %s57_s9 = sshll.u32 %s580_s3, 4  ;;  %s21_s29 = int_to_ptr.vmem [resolvable:$true] %s20_s29  ;;  %s58_s9 = int_to_ptr.hbm [resolvable:$true] %s57_s9 }
   0x8   :  { %26 = dma.hbm_to_vmem [thread:$0]  %s19_s25, 256, %s21_s29, [#allocation3], %s469_s26, %s469_s26, %s470_s27  }
   0x9   :  { %s472_s10 = smov [#allocation6]   ;;  %s473_s0 = smov [#allocation7]  }
   0xa   :  { %s46_s11 = sshll.u32 %s472_s10, 4  ;;  %s59_s12 = sshll.u32 %s473_s0, 4  ;;  %s47_s11 = int_to_ptr.vmem [resolvable:$true] %s46_s11  ;;  %s60_s12 = int_to_ptr.vmem [resolvable:$true] %s59_s12 }
   0xb   :  { %52 = dma.hbm_to_vmem [thread:$0]  %s45_s7, 256, %s47_s11, [#allocation5], %s469_s26, %s469_s26, %s470_s27  }
   0xc   :  { %65 = dma.hbm_to_vmem [thread:$0]  %s58_s9, 256, %s60_s12, [#allocation8], %s469_s26, %s469_s26, %s470_s27  }
   0xd   :  { %462 = dma.done.wait [#allocation3], 256  }
   0xe   :  { %463 = vsyncadd [#allocation3], 4294967040 }
   0xf   :  { %464 = dma.done.wait [#allocation5], 512  }
  0x10   :  { %465 = vsyncadd [#allocation5], 4294966784 }
  0x11   :  { %466 = dma.done.wait [#allocation8], 256  }
  0x12   :  { %467 = vsyncadd [#allocation8], 4294967040  ;;  %v82_v0 = vld [vmem:[#allocation2] sm:$0xff]  ;;  %v84_v1 = vld [vmem:[#allocation4] sm:$0xff]  ;;  %vm96_vm0 = vcmask 261120   ;;  %v474_v22 = vmov 0.0  }
  0x13   :  { %v83_v2 = vld [vmem:[#allocation2 + $0x8] sm:$0xff]  ;;  %v86_v3 = vmul.f32 %v84_v1, %v82_v0  ;;  %v85_v4 = vld [vmem:[#allocation4 + $0x8] sm:$0xff]  ;;  %v88_v39 = vld [vmem:[#allocation6] sm:$0xff] }
  0x14   :  { %v87_v6 = vmul.f32 %v85_v4, %v83_v2  ;;  %v90_v40 = vld [vmem:[#allocation7] sm:$0xff]  ;;  %v89_v46 = vld [vmem:[#allocation6 + $0x8] sm:$0xff]  ;;  %v91_v47 = vld [vmem:[#allocation7 + $0x8] sm:$0xff] }
  0x15   :  { %v94_v5 = vmul.f32 %v86_v3, %v86_v3  ;;  %v92_v42 = vmul.f32 %v90_v40, %v88_v39  ;;  %v93_v49 = vmul.f32 %v91_v47, %v89_v46 }
  0x16   :  { %v95_v8 = vmul.f32 %v87_v6, %v87_v6 }
  0x17   :  { %v97_v7 = vsel %vm96_vm0, %v94_v5, -inf  ;;  %v231_v44 = vmul.f32 %v92_v42, %v92_v42  ;;  %v232_v52 = vmul.f32 %v93_v49, %v93_v49 }
  0x18   :  { %98 = vmax.xlane.f32.xlu0 %v97_v7  ;;  %v100_v9 = vsel %vm96_vm0, %v95_v8, -inf }
  0x19   :  { %v233_v45 = vsel %vm96_vm0, %v231_v44, 0.0  ;;  %v236_v54 = vsel %vm96_vm0, %v232_v52, 0.0 }
  0x20   :  { %101 = vmax.xlane.f32.xlu0 %v100_v9 }
  0x8b   :  { %v519_v10 = vpop.xlane.xlu0 %98 }
  0x8c   :  { %vm103_vm1 = vcmp.eq.f32.partialorder %v94_v5, %v519_v10 }
  0x8d   :  { %v123_v11 = vsel %vm103_vm1, -1.0, %v94_v5  ;;  %v343_v23 = vsel %vm103_vm1, 1.0, %v474_v22  ;;  %vm329_vm1 = vcmask 122880  }
  0x8e   :  { %v125_v12 = vsel %vm96_vm0, %v123_v11, -inf  ;;  %v109_v24 = vsel %vm96_vm0, %v343_v23, 0.0 }
  0x8f   :  { %126 = vmax.xlane.f32.xlu1 %v125_v12 }
  0x93   :  { %v525_v13 = vpop.xlane.xlu0 %101 }
  0x94   :  { %vm104_vm2 = vcmp.eq.f32.partialorder %v95_v8, %v525_v13 }
  0x95   :  { %v124_v14 = vsel %vm104_vm2, -1.0, %v95_v8  ;;  %v344_v31 = vsel %vm104_vm2, 1.0, %v474_v22 }
  0x96   :  { %v128_v15 = vsel %vm96_vm0, %v124_v14, -inf  ;;  %v112_v34 = vsel %vm96_vm0, %v344_v31, 0.0 }
  0x97   :  { %129 = vmax.xlane.f32.xlu1 %v128_v15 }
 0x102   :  { %v531_v16 = vpop.xlane.xlu1 %126 }
 0x103   :  { %vm131_vm3 = vcmp.eq.f32.partialorder %v123_v11, %v531_v16 }
 0x104   :  { %v151_v17 = vsel %vm131_vm3, -1.0, %v123_v11  ;;  %v345_v35 = vsel %vm131_vm3, 1.0, %v474_v22 }
 0x105   :  { %v153_v18 = vsel %vm96_vm0, %v151_v17, -inf  ;;  %v137_v37 = vsel %vm96_vm0, %v345_v35, 0.0 }
 0x106   :  { %154 = vmax.xlane.f32.xlu2 %v153_v18 }
 0x10a   :  { %v537_v19 = vpop.xlane.xlu1 %129 }
 0x10b   :  { %vm132_vm4 = vcmp.eq.f32.partialorder %v124_v14, %v537_v19 }
 0x10c   :  { %v152_v20 = vsel %vm132_vm4, -1.0, %v124_v14  ;;  %v346_v25 = vsel %vm132_vm4, 1.0, %v474_v22 }
 0x10d   :  { %v156_v21 = vsel %vm96_vm0, %v152_v20, -inf  ;;  %v140_v26 = vsel %vm96_vm0, %v346_v25, 0.0 }
 0x10e   :  { %157 = vmax.xlane.f32.xlu2 %v156_v21 }
 0x116   :  { %110 = vadd.xlane.f32.xlu2 %v109_v24 }
 0x11e   :  { %141 = vadd.xlane.f32.xlu2 %v140_v26 }
 0x179   :  { %v545_v27 = vpop.xlane.xlu2 %154 }
 0x17a   :  { %vm159_vm5 = vcmp.eq.f32.partialorder %v151_v17, %v545_v27 }
 0x17b   :  { %v179_v28 = vsel %vm159_vm5, -1.0, %v151_v17  ;;  %v347_v36 = vsel %vm159_vm5, 1.0, %v474_v22 }
 0x17c   :  { %v181_v29 = vsel %vm96_vm0, %v179_v28, -inf  ;;  %v165_v38 = vsel %vm96_vm0, %v347_v36, 0.0 }
 0x17d   :  { %182 = vmax.xlane.f32.xlu0 %v181_v29 }
 0x181   :  { %v549_v30 = vpop.xlane.xlu2 %157 }
 0x182   :  { %vm160_vm6 = vcmp.eq.f32.partialorder %v152_v20, %v549_v30 }
 0x183   :  { %v180_v32 = vsel %vm160_vm6, -1.0, %v152_v20  ;;  %v348_v41 = vsel %vm160_vm6, 1.0, %v474_v22 }
 0x184   :  { %v184_v33 = vsel %vm96_vm0, %v180_v32, -inf  ;;  %v168_v43 = vsel %vm96_vm0, %v348_v41, 0.0 }
 0x185   :  { %185 = vmax.xlane.f32.xlu1 %v184_v33  ;;  %113 = vadd.xlane.f32.xlu0 %v112_v34 }
 0x189   :  { %v111_v7 = vpop.xlane.xlu2 %110 }
 0x18a   :  { %v115_v8 = vmin.f32 %v111_v7, 4.0 }
 0x18c   :  { %v121_v11 = vsub.f32 4.0, %v115_v8  ;;  %v117_v24 = vmul.f32 %v115_v8, %v519_v10 }
 0x18d   :  { %138 = vadd.xlane.f32.xlu1 %v137_v37  ;;  %166 = vadd.xlane.f32.xlu0 %v165_v38 }
 0x191   :  { %v142_v17 = vpop.xlane.xlu2 %141 }
 0x195   :  { %169 = vadd.xlane.f32.xlu1 %v168_v43 }
 0x19d   :  { %234 = vadd.xlane.f32.xlu1 %v233_v45 }
 0x1f0   :  { %v183_v48 = vpop.xlane.xlu0 %182 }
 0x1f1   :  { %vm187_vm7 = vcmp.eq.f32.partialorder %v179_v28, %v183_v48 }
 0x1f2   :  { %v349_v50 = vsel %vm187_vm7, 1.0, %v474_v22 }
 0x1f3   :  { %v193_v51 = vsel %vm96_vm0, %v349_v50, 0.0 }
 0x1f4   :  { %194 = vadd.xlane.f32.xlu2 %v193_v51 }
 0x1f8   :  { %v186_v53 = vpop.xlane.xlu1 %185  ;;  %v114_v9 = vpop.xlane.xlu0 %113 }
 0x1f9   :  { %vm188_vm8 = vcmp.eq.f32.partialorder %v180_v32, %v186_v53  ;;  %v116_v14 = vmin.f32 %v114_v9, 4.0 }
 0x1fa   :  { %v350_v55 = vsel %vm188_vm8, 1.0, %v474_v22 }
 0x1fb   :  { %v196_v56 = vsel %vm96_vm0, %v350_v55, 0.0  ;;  %v122_v18 = vsub.f32 4.0, %v116_v14  ;;  %v118_v38 = vmul.f32 %v116_v14, %v525_v13 }
 0x1fc   :  { %197 = vadd.xlane.f32.xlu0 %v196_v56  ;;  %237 = vadd.xlane.f32.xlu2 %v236_v54 }
 0x1fd   :  { %v144_v22 = vmin.f32 %v142_v17, %v122_v18 }
 0x1ff   :  { %v150_v31 = vsub.f32 %v122_v18, %v144_v22  ;;  %v146_v36 = vmul.f32 %v144_v22, %v537_v19 }
 0x200   :  { %v139_v57 = vpop.xlane.xlu1 %138  ;;  %v167_v20 = vpop.xlane.xlu0 %166 }
 0x201   :  { %v143_v12 = vmin.f32 %v139_v57, %v121_v11 }
 0x203   :  { %v149_v15 = vsub.f32 %v121_v11, %v143_v12  ;;  %v145_v23 = vmul.f32 %v143_v12, %v531_v16 }
 0x205   :  { %v171_v21 = vmin.f32 %v167_v20, %v149_v15  ;;  %v147_v29 = vadd.f32 %v145_v23, %v117_v24 }
 0x207   :  { %v173_v25 = vmul.f32 %v171_v21, %v545_v27  ;;  %v177_v26 = vsub.f32 %v149_v15, %v171_v21  ;;  %v148_v27 = vadd.f32 %v146_v36, %v118_v38 }
 0x208   :  { %v170_v58 = vpop.xlane.xlu1 %169 }
 0x209   :  { %v175_v33 = vadd.f32 %v173_v25, %v147_v29  ;;  %v172_v34 = vmin.f32 %v170_v58, %v150_v31 }
 0x20b   :  { %v174_v39 = vmul.f32 %v172_v34, %v549_v30  ;;  %v178_v16 = vsub.f32 %v150_v31, %v172_v34 }
 0x20d   :  { %v176_v42 = vadd.f32 %v174_v39, %v148_v27 }
 0x210   :  { %v235_v59 = vpop.xlane.xlu1 %234 }
 0x211   :  { %358 = vrsqrt.f32 %v235_v59  ;;  %vm246_vm9 = vcmp.eq.f32.partialorder %v235_v59, inf  ;;  %v249_v3 = vand.u32 2147483648, %v235_v59  ;;  %vm248_vm10 = vcmp.eq.f32.partialorder %v235_v59, 0.0 }
 0x217   :  { %v359_v60 = vpop.eup %358 }
 0x218   :  { %v240_v61 = vmul.f32 %v359_v60, %v235_v59 }
 0x21a   :  { %v241_v62 = vmul.f32 %v359_v60, %v240_v61 }
 0x21c   :  { %v242_v63 = vmul.f32 0.5, %v241_v62 }
 0x21e   :  { %v243_v0 = vsub.f32 1.5, %v242_v63 }
 0x220   :  { %v244_v1 = vmul.f32 %v359_v60, %v243_v0 }
 0x222   :  { %v245_v2 = vmul.f32 %v244_v1, %v235_v59 }
 0x224   :  { %v247_v4 = vsel %vm246_vm9, %v235_v59, %v245_v2 }
 0x225   :  { %v250_v5 = vsel %vm248_vm10, %v249_v3, %v247_v4 }
 0x226   :  { %v263_v6 = vmul.f32 0.33333334, %v250_v5 }
 0x228   :  { %297 = vxpose.xlu1.b32.start [1/2] (short) (narrow) %v263_v6, 8 }
 0x267   :  { %v195_v28 = vpop.xlane.xlu2 %194 }
 0x268   :  { %v199_v32 = vmin.f32 %v195_v28, %v177_v26 }
 0x26a   :  { %v201_v35 = vmul.f32 %v199_v32, %v183_v48 }
 0x26c   :  { %v203_v37 = vadd.f32 %v201_v35, %v175_v33 }
 0x26e   :  { %360 = vrsqrt.f32 %v203_v37  ;;  %vm212_vm11 = vcmp.eq.f32.partialorder %v203_v37, inf  ;;  %vm214_vm12 = vcmp.eq.f32.partialorder %v203_v37, 0.0 }
 0x26f   :  { %v238_v10 = vpop.xlane.xlu2 %237  ;;  %v198_v40 = vpop.xlane.xlu0 %197 }
 0x270   :  { %362 = vrsqrt.f32 %v238_v10  ;;  %v200_v41 = vmin.f32 %v198_v40, %v178_v16  ;;  %vm258_vm13 = vcmp.eq.f32.partialorder %v238_v10, inf  ;;  %v261_v63 = vand.u32 2147483648, %v238_v10 }
 0x271   :  { %vm260_vm14 = vcmp.eq.f32.partialorder %v238_v10, 0.0 }
 0x272   :  { %v202_v43 = vmul.f32 %v200_v41, %v186_v53  ;;  %v215_v53 = vand.u32 2147483648, %v203_v37 }
 0x274   :  { %v361_v44 = vpop.eup %360  ;;  %v204_v45 = vadd.f32 %v202_v43, %v176_v42 }
 0x275   :  { %v206_v46 = vmul.f32 %v361_v44, %v203_v37 }
 0x276   :  { %v363_v47 = vpop.eup %362  ;;  %364 = vrsqrt.f32 %v204_v45  ;;  %vm224_vm15 = vcmp.eq.f32.partialorder %v204_v45, inf  ;;  %v227_v7 = vand.u32 2147483648, %v204_v45  ;;  %vm226_vm0 = vcmp.eq.f32.partialorder %v204_v45, 0.0 }
 0x277   :  { %v252_v19 = vmul.f32 %v363_v47, %v238_v10  ;;  %v207_v48 = vmul.f32 %v361_v44, %v206_v46 }
 0x279   :  { %v253_v49 = vmul.f32 %v363_v47, %v252_v19  ;;  %v208_v13 = vmul.f32 0.5, %v207_v48 }
 0x27b   :  { %v254_v50 = vmul.f32 0.5, %v253_v49  ;;  %v209_v30 = vsub.f32 1.5, %v208_v13 }
 0x27c   :  { %v365_v51 = vpop.eup %364 }
 0x27d   :  { %v255_v52 = vsub.f32 1.5, %v254_v50  ;;  %v210_v54 = vmul.f32 %v361_v44, %v209_v30  ;;  %v218_v55 = vmul.f32 %v365_v51, %v204_v45 }
 0x27f   :  { %v211_v56 = vmul.f32 %v210_v54, %v203_v37  ;;  %v256_v57 = vmul.f32 %v363_v47, %v255_v52  ;;  %v219_v58 = vmul.f32 %v365_v51, %v218_v55 }
 0x281   :  { %v213_v59 = vsel %vm212_vm11, %v203_v37, %v211_v56  ;;  %v257_v60 = vmul.f32 %v256_v57, %v238_v10  ;;  %v220_v61 = vmul.f32 0.5, %v219_v58 }
 0x282   :  { %v216_v62 = vsel %vm214_vm12, %v215_v53, %v213_v59 }
 0x283   :  { %v229_v0 = vmul.f32 0.33333334, %v216_v62  ;;  %v259_v1 = vsel %vm258_vm13, %v238_v10, %v257_v60  ;;  %v221_v2 = vsub.f32 1.5, %v220_v61 }
 0x284   :  { %v262_v3 = vsel %vm260_vm14, %v261_v63, %v259_v1 }
 0x285   :  { %265 = vxpose.xlu0.b32.start [1/2] (short) (narrow) %v229_v0, 8  ;;  %v264_v4 = vmul.f32 0.33333334, %v262_v3  ;;  %v222_v5 = vmul.f32 %v365_v51, %v221_v2 }
 0x287   :  { %298 = vxpose.xlu1.b32.end [2/2] (short) (narrow) %v264_v4, 8  ;;  %v223_v6 = vmul.f32 %v222_v5, %v204_v45 }
 0x289   :  { %v225_v8 = vsel %vm224_vm15, %v204_v45, %v223_v6 }
 0x28a   :  { %v228_v9 = vsel %vm226_vm0, %v227_v7, %v225_v8 }
 0x28b   :  { %v230_v11 = vmul.f32 0.33333334, %v228_v9 }
 0x28d   :  { %266 = vxpose.xlu0.b32.end [2/2] (short) (narrow) %v230_v11, 8 }
 0x323   :  { %v313_v12 = vpop.trf.xlu1 }
 0x324   :  { %331 = vst.msk [vmem:[%s582_s5] sm:$0x1] %vm329_vm1, %v313_v12 }
 0x329   :  { %v281_v14 = vpop.trf.xlu0 }
 0x32a   :  { %330 = vst.msk [vmem:[%s581_s4] sm:$0x1] %vm329_vm1, %v281_v14 }
 0x32b   :  { %340 = vsyncpa [#allocation3], 1 }
 0x32c   :  { %341 = vsyncpa [#allocation5], 1 }
 0x32d   :  { %342 = vsyncpa [#allocation8], 1 }

</bundles_post_ra>
